<compile_context>
chip_gen: v7x
topology: tpu7x:2x2x1
jax: 0.10.0
libtpu: 0.0.40
codegen_flags: <defaults>
</compile_context>

<pallas_src>
import jax
import jax.numpy as jnp
from jax import lax
from jax.experimental import pallas as pl
from jax.experimental.pallas import tpu as pltpu


def gln_kernel(y_ref, gamma_ref, beta_ref, o_ref):
    # y_ref:     (1, TB, NK)   -- TB batch rows, each row is a flattened (N,K) slab
    # gamma_ref: (1, 1, NK)    -- gamma tiled along N (pattern repeats every K)
    # beta_ref:  (1, 1, NK)
    y = y_ref[...].astype(jnp.float32)
    nk = y.shape[-1]
    inv_nk = jnp.float32(1.0 / nk)

    # Pass 1: per-batch-row mean (XLU cross-lane reduce, f32 accumulation).
    mean = jnp.sum(y, axis=-1, keepdims=True) * inv_nk          # (1, TB, 1)

    # Pass 2: variance of the centered data (data is VMEM-resident, so the
    # second sweep costs no extra HBM traffic; diff is reused for the output).
    diff = y - mean                                              # (1, TB, NK)
    var = jnp.sum(diff * diff, axis=-1, keepdims=True) * inv_nk  # (1, TB, 1)
    inv_std = lax.rsqrt(var + jnp.float32(1e-7))                 # EUP rsqrt

    g = gamma_ref[...].astype(jnp.float32)                       # (1, 1, NK)
    b = beta_ref[...].astype(jnp.float32)

    # Hot sweep: per-row scalar scale, then per-lane (tiled gamma/beta) affine.
    o_ref[...] = (diff * inv_std * g + b).astype(o_ref.dtype)


def _choose_batch_tile(m, nk, itemsize, target_block_bytes=2 << 20):
    """Largest divisor TB of m such that the per-step block stays within the
    VMEM budget and the grid keeps >= 2 steps (pipelining / megacore)
    whenever m >= 2."""
    best = 1
    for d in range(1, m + 1):
        if m % d:
            continue
        if d * nk * itemsize > target_block_bytes:
            continue
        if m >= 2 and (m // d) < 2:
            continue
        best = max(best, d)
    return best


def global_layer_norm(y, gamma, beta):
    """y: [M, N, K]; gamma/beta: [1, 1, K]. Returns [M, N, K]."""
    M, N, K = y.shape
    NK = N * K
    itemsize = jnp.dtype(y.dtype).itemsize

    # Lane-dense flattening: (M, N, K) -> (M//TB, TB, N*K). Pure view reshape.
    TB = _choose_batch_tile(M, NK, itemsize)
    G = M // TB
    y3 = y.reshape(G, TB, NK)

    # Tile gamma/beta once (outside the kernel) so flattened index j = n*K + k
    # still sees gamma[k] / beta[k].
    gamma_t = jnp.tile(jnp.reshape(gamma, (K,)), (N,)).reshape(1, 1, NK).astype(y.dtype)
    beta_t = jnp.tile(jnp.reshape(beta, (K,)), (N,)).reshape(1, 1, NK).astype(y.dtype)

    # Explicit VMEM budget: double-buffered in + out blocks, params, headroom.
    block_bytes = TB * NK * itemsize
    vmem_limit = int(min(64 << 20, max(16 << 20, 8 * block_bytes + (2 << 20))))

    out3 = pl.pallas_call(
        gln_kernel,
        out_shape=jax.ShapeDtypeStruct((G, TB, NK), y.dtype),
        grid_spec=pltpu.PrefetchScalarGridSpec(
            num_scalar_prefetch=0,
            grid=(G,),
            in_specs=[
                pl.BlockSpec((1, TB, NK), lambda m: (m, 0, 0)),
                pl.BlockSpec((1, 1, NK), lambda m: (0, 0, 0)),
                pl.BlockSpec((1, 1, NK), lambda m: (0, 0, 0)),
            ],
            out_specs=pl.BlockSpec((1, TB, NK), lambda m: (m, 0, 0)),
        ),
        compiler_params=pltpu.CompilerParams(
            dimension_semantics=("parallel",),
            vmem_limit_bytes=vmem_limit,
        ),
    )(y3, gamma_t, beta_t)

    return out3.reshape(M, N, K)


def global_layer_norm_ref(y, gamma, beta):
    # Pure-JAX reference mirroring the PyTorch forward exactly.
    mean = jnp.mean(jnp.mean(y, axis=1, keepdims=True), axis=2, keepdims=True)
    var = jnp.mean(
        jnp.mean((y - mean) ** 2, axis=1, keepdims=True), axis=2, keepdims=True
    )
    return gamma * (y - mean) / jnp.power(var + 1e-7, 0.5) + beta


if __name__ == "__main__":
    # Shapes consistent with the module: y: [M, N, K], gamma/beta: [1, 1, K].
    # N*K = 512 is a multiple of 128 -> lane-dense blocks; grid has 2 steps.
    M, N, K = 8, 16, 32

    key = jax.random.PRNGKey(0)
    ky, kg, kb = jax.random.split(key, 3)
    y = jax.random.normal(ky, (M, N, K), dtype=jnp.float32)

    # Non-trivial (but deterministic) learnable params to exercise the per-K
    # broadcast; module init would be gamma=1, beta=0.
    gamma = 1.0 + 0.1 * jax.random.normal(kg, (1, 1, K), dtype=jnp.float32)
    beta = 0.1 * jax.random.normal(kb, (1, 1, K), dtype=jnp.float32)

    out = global_layer_norm(y, gamma, beta)
    out = jax.block_until_ready(out)

    ref = global_layer_norm_ref(y, gamma, beta)
    assert out.shape == (M, N, K)
    assert jnp.allclose(out, ref, atol=1e-5, rtol=1e-5), "mismatch vs reference"

    print("KERNEL_OK")
</pallas_src>

<mosaic_0001>
module attributes {stable_mosaic.version = 11 : i64} {
  func.func @gln_kernel(%arg0: i32, %arg1: memref<1x4x512xf32, #tpu.memory_space<vmem>>, %arg2: memref<1x1x512xf32, #tpu.memory_space<vmem>>, %arg3: memref<1x1x512xf32, #tpu.memory_space<vmem>>, %arg4: memref<1x4x512xf32, #tpu.memory_space<vmem>>) attributes {dimension_semantics = [#tpu.dimension_semantics<parallel>], iteration_bounds = array<i64: 2>, scalar_prefetch = 0 : i64, scratch_operands = 0 : i64, tpu.core_type = #tpu.core_type<tc>, window_params = [{transform_indices = @transform_0, window_bounds = array<i64: 1, 4, 512>}, {pipeline_mode = #tpu.pipeline_mode<synchronous>, transform_indices = @transform_1, window_bounds = array<i64: 1, 1, 512>}, {pipeline_mode = #tpu.pipeline_mode<synchronous>, transform_indices = @transform_2, window_bounds = array<i64: 1, 1, 512>}, {transform_indices = @transform_3, window_bounds = array<i64: 1, 4, 512>}]} {
    %c0 = arith.constant 0 : index
    %c0_0 = arith.constant 0 : index
    %c0_1 = arith.constant 0 : index
    %0 = vector.load %arg1[%c0, %c0_0, %c0_1] : memref<1x4x512xf32, #tpu.memory_space<vmem>>, vector<1x4x512xf32>
    %cst = arith.constant dense<0.000000e+00> : vector<1x4xf32>
    %1 = vector.multi_reduction <add>, %0, %cst [2] : vector<1x4x512xf32> to vector<1x4xf32>
    %2 = vector.shape_cast %1 : vector<1x4xf32> to vector<1x4x1xf32>
    %cst_2 = arith.constant 0.001953125 : f32
    %3 = vector.broadcast %cst_2 : f32 to vector<1x4x1xf32>
    %4 = arith.mulf %2, %3 : vector<1x4x1xf32>
    %5 = vector.broadcast %4 : vector<1x4x1xf32> to vector<1x4x512xf32>
    %6 = arith.subf %0, %5 : vector<1x4x512xf32>
    %7 = arith.mulf %6, %6 : vector<1x4x512xf32>
    %cst_3 = arith.constant dense<0.000000e+00> : vector<1x4xf32>
    %8 = vector.multi_reduction <add>, %7, %cst_3 [2] : vector<1x4x512xf32> to vector<1x4xf32>
    %9 = vector.shape_cast %8 : vector<1x4xf32> to vector<1x4x1xf32>
    %cst_4 = arith.constant 0.001953125 : f32
    %10 = vector.broadcast %cst_4 : f32 to vector<1x4x1xf32>
    %11 = arith.mulf %9, %10 : vector<1x4x1xf32>
    %cst_5 = arith.constant 1.000000e-07 : f32
    %12 = vector.broadcast %cst_5 : f32 to vector<1x4x1xf32>
    %13 = arith.addf %11, %12 : vector<1x4x1xf32>
    %14 = math.rsqrt %13 : vector<1x4x1xf32>
    %c0_6 = arith.constant 0 : index
    %c0_7 = arith.constant 0 : index
    %c0_8 = arith.constant 0 : index
    %15 = vector.load %arg2[%c0_6, %c0_7, %c0_8] : memref<1x1x512xf32, #tpu.memory_space<vmem>>, vector<1x1x512xf32>
    %c0_9 = arith.constant 0 : index
    %c0_10 = arith.constant 0 : index
    %c0_11 = arith.constant 0 : index
    %16 = vector.load %arg3[%c0_9, %c0_10, %c0_11] : memref<1x1x512xf32, #tpu.memory_space<vmem>>, vector<1x1x512xf32>
    %17 = vector.broadcast %14 : vector<1x4x1xf32> to vector<1x4x512xf32>
    %18 = arith.mulf %6, %17 : vector<1x4x512xf32>
    %19 = vector.broadcast %15 : vector<1x1x512xf32> to vector<1x4x512xf32>
    %20 = arith.mulf %18, %19 : vector<1x4x512xf32>
    %21 = vector.broadcast %16 : vector<1x1x512xf32> to vector<1x4x512xf32>
    %22 = arith.addf %20, %21 : vector<1x4x512xf32>
    %c0_12 = arith.constant 0 : index
    %c0_13 = arith.constant 0 : index
    %c0_14 = arith.constant 0 : index
    %23 = vector.load %arg4[%c0_12, %c0_13, %c0_14] : memref<1x4x512xf32, #tpu.memory_space<vmem>>, vector<1x4x512xf32>
    tpu.vector_store %arg4[%c0_12, %c0_13, %c0_14], %22 {strides = array<i32>} : memref<1x4x512xf32, #tpu.memory_space<vmem>>, vector<1x4x512xf32>,
    return
  }
  func.func @transform_0(%arg0: i32) -> (i32, i32, i32) {
    %c0_i32 = arith.constant 0 : i32
    %c0_i32_0 = arith.constant 0 : i32
    %c0_i32_1 = arith.constant 0 : i32
    return %arg0, %c0_i32, %c0_i32_0 : i32, i32, i32
  }
  func.func @transform_1(%arg0: i32) -> (i32, i32, i32) {
    %c0_i32 = arith.constant 0 : i32
    %c0_i32_0 = arith.constant 0 : i32
    %c0_i32_1 = arith.constant 0 : i32
    %c0_i32_2 = arith.constant 0 : i32
    return %c0_i32, %c0_i32_0, %c0_i32_1 : i32, i32, i32
  }
  func.func @transform_2(%arg0: i32) -> (i32, i32, i32) {
    %c0_i32 = arith.constant 0 : i32
    %c0_i32_0 = arith.constant 0 : i32
    %c0_i32_1 = arith.constant 0 : i32
    %c0_i32_2 = arith.constant 0 : i32
    return %c0_i32, %c0_i32_0, %c0_i32_1 : i32, i32, i32
  }
  func.func @transform_3(%arg0: i32) -> (i32, i32, i32) {
    %c0_i32 = arith.constant 0 : i32
    %c0_i32_0 = arith.constant 0 : i32
    %c0_i32_1 = arith.constant 0 : i32
    return %arg0, %c0_i32, %c0_i32_0 : i32, i32, i32
  }
}

</mosaic_0001>

<bundles_post_ra>
// kernel: tpu_custom_call.1
= control target key start
LH: loop header
LB: loop body
LE: loop exit
PB: predicated region body
PF: predicated region fallthrough
CT: control target
= control target key end

     0   :  { %8 = vsyncpa [#allocation3], 0  ;;  %s856_s0 = inlined_call_operand.hbm [shape: f32[2,4,512], index: 0, kind: input, shape index: {}]   ;;  %s857_s1 = inlined_call_operand.hbm [shape: f32[1,1,512], index: 1, kind: input, shape index: {}]   ;;  %s858_s2 = inlined_call_operand.vmem [shape: f32[1,1,512], index: 2, kind: input, shape index: {}]   ;;  %s859_s3 = inlined_call_operand.hbm [shape: f32[2,4,512], index: 3, kind: output, shape index: {}]  }
   0x1   :  { %10 = vsyncpa [#allocation3 + $0x1], 0 }
   0x2   :  { %11 = vsyncpa [#allocation6], 0 }
   0x3   :  { %12 = vsyncpa [#allocation4], 0 }
   0x4   :  { %14 = vsyncpa [#allocation4 + $0x1], 0  ;;  %s640_s12 = smov 0   ;;  %s642_s13 = smov 0  }
   0x5   :  { %s644_s14 = smov 0   ;;  %s646_s15 = smov 0  }
   0x6 LB: > { %s661_s16 = sadd.s32 4294967295, %s614_s15   ;;  %s406_s17 = sadd.s32 4294967294, %s614_s15   ;;  %s614_s15 = sphi %s646_s15, %s883_s15   ;;  %s610_s14 = sphi %s644_s14, %s882_s14   ;;  %s606_s13 = sphi %s642_s13, %s881_s13   ;;  %s602_s12 = sphi %s640_s12, %s880_s12  }
   0x7   : > { %p40_p0 = scmp.ne.s32.totalorder %s606_s13, %s602_s12  ;;  %p860_p1 = scmp.eq.s32.totalorder %s661_s16, 0 }
   0x8   : > { %p112_p3 = scmp.eq.s32.totalorder %s406_s17, 1  ;;  %p407_p5 = scmp.ge.s32.totalorder %s614_s15, 1 }
   0x9   : > { %p670_p4 = por %p860_p1, %p40_p0  ;;  %p119_p7 = scmp.lt.s32.totalorder %s614_s15, 3 }
   0xa   : > { %p675_p6 = por %p112_p3, %p40_p0  ;;  %s616_s21 = smov [#allocation5]  }
   0xb   : > { %s863_s18 = scalar_select %p670_p4, 1, 0 }
   0xc   : > { %s864_s19 = scalar_select %p675_p6, 1, 0 }
   0xd   : > { %p680_p8 = pnand %p407_p5, %p119_p7  ;;  %s132_s22 = sshll.u32 %s616_s21, 4  ;;  %s133_s22 = int_to_ptr.vmem [resolvable:$true] %s132_s22 }
   0xe   : > { %s688_s23 = sadd.s32 1, %s614_s15   ;;  %s27_s27 = sadd.s32 1, %s610_s14 }
   0xf   : > { %s865_s20 = scalar_select %p680_p8, 1, 0 }
  0x10   : > { %p432_p10 = pneg %p680_p8  ;;  %s24_s25 = ssub.s32 %s614_s15, %s688_s23 }
  0x11   : > { %p698_p12 = scmp.eq.s32.totalorder %s24_s25, 0  ;;  %s486_s30 = scalar_lea.hbm %s857_s1, 64 }
  0x12   : > { %p692_p11 = pnand %p432_p10, %p860_p1  ;;  %p487_p0 = scmp.ne.s32.totalorder %s857_s1, %s486_s30 }
  0x13   : > { %s867_s26 = scalar_select %p698_p12, 1, 0 }
  0x14   : > { %p488_p3 = pneg %p692_p11  ;;  %p493_p10 = scmp.lt.u32.totalorder %s486_s30, %s857_s1 }
  0x16   : > { %p489_p5 = pnand %p488_p3, %p487_p0 }
  0x18   : > { %p490_p7 = pneg %p489_p5 }
  0x1a   : > { %p495_p9 = pnand %p493_p10, %p490_p7 }
  0x1c   : > { %498 = shalt.err (!%p495_p9)
}
  0x1d   : > { %s499_s8 = scalar_lea.vmem %s133_s22, 64  ;;  %p507_p6 = scmp.lt.s32.totalorder %s133_s22, %s133_s22 }
  0x1e   : > { %p500_p1 = scmp.ne.s32.totalorder %s133_s22, %s499_s8  ;;  %p508_p4 = scmp.lt.s32.totalorder %s499_s8, %s499_s8 }
  0x20   : > { %p502_p2 = pnand %p500_p1, %p488_p3  ;;  %p509_p8 = por %p508_p4, %p507_p6 }
  0x22   : > { %p503_p13 = pneg %p502_p2 }
  0x24   : > { %p510_p12 = pnand %p509_p8, %p503_p13 }
  0x26   : > { %513 = shalt.err (!%p510_p12)
}
  0x27   : > { %435 = dma.hbm_to_vmem [thread:$0]  (!%p692_p11), %s857_s1, 64, %s133_s22, [#allocation6]  }
  0x28   : > { %p868_p1 = scmp.ne.s32.totalorder %s867_s26, 0  ;;  %p35_p2 = scmp.eq.s32.totalorder %s614_s15, 0 }
  0x29   : > { %p869_p4 = scmp.ne.s32.totalorder %s610_s14, %s606_s13  ;;  %p870_p6 = scmp.eq.s32.totalorder %s661_s16, 1 }
  0x2a   : > { %s724_s11 = scalar_select %p868_p1, %s610_s14, %s27_s27  }
  0x2b   : > { %p732_p8 = por %p870_p6, %p869_p4  ;;  %p445_p9 = scmp.lt.s32.totalorder %s614_s15, 2 }
  0x2c   : > { %s146_s21 = sand.u32 1, %s610_s14   ;;  %p872_p12 = pmov %p869_p4 }
  0x2d   : > { %s410_s24 = sshll.u32 %s146_s21, 4  ;;  %s422_s25 = sshll.u32 %s614_s15, 8 }
  0x2e   : > { %p36_p13 = por %p35_p2, %p872_p12  ;;  %s745_s22 = scalar_lea.hbm %s856_s0, %s422_s25 }
  0x2f   : > { %s150_s26 = scalar_lea.vmem [#allocation2], %s410_s24  ;;  %s147_s4 = scalar_lea.sflag [#allocation3], %s146_s21 }
  0x30   : > { %s158_s27 = sshll.u32 %s150_s26, 4  ;;  %p747_p11 = pnand %p445_p9, %p36_p13  ;;  %s751_s27 = int_to_ptr.vmem [resolvable:$true] %s158_s27 }
  0x31   : > { %s514_s5 = scalar_lea.hbm %s745_s22, 256  ;;  %s519_s8 = scalar_lea.hbm %s856_s0, 512 }
  0x32   : > { %p515_p0 = scmp.ne.s32.totalorder %s745_s22, %s514_s5  ;;  %p516_p3 = pneg %p747_p11 }
  0x33   : > { %p520_p10 = scmp.lt.u32.totalorder %s745_s22, %s856_s0  ;;  %p521_p1 = scmp.lt.u32.totalorder %s519_s8, %s514_s5 }
  0x34   : > { %p517_p5 = pnand %p516_p3, %p515_p0  ;;  %p523_p4 = scmp.lt.u32.totalorder %s514_s5, %s745_s22 }
  0x35   : > { %p522_p2 = por %p521_p1, %p520_p10 }
  0x36   : > { %p518_p7 = pneg %p517_p5 }
  0x37   : > { %p524_p6 = por %p523_p4, %p522_p2 }
  0x39   : > { %p525_p9 = pnand %p524_p6, %p518_p7 }
  0x3b   : > { %528 = shalt.err (!%p525_p9)
}
  0x3c   : > { %s529_s21 = scalar_lea.vmem %s751_s27, 256  ;;  %s617_s24 = smov [#allocation2]  }
  0x3d   : > { %p530_p12 = scmp.ne.s32.totalorder %s751_s27, %s529_s21  ;;  %s534_s25 = sshll.u32 %s617_s24, 4  ;;  %s535_s25 = int_to_ptr.vmem [resolvable:$false] %s534_s25 }
  0x3e   : > { %s536_s28 = scalar_lea.vmem %s535_s25, 512  ;;  %p537_p5 = scmp.lt.s32.totalorder %s751_s27, %s535_s25 }
  0x3f   : > { %p532_p13 = pnand %p530_p12, %p516_p3  ;;  %p538_p10 = scmp.lt.s32.totalorder %s536_s28, %s529_s21 }
  0x41   : > { %p533_p0 = pneg %p532_p13  ;;  %p539_p1 = por %p538_p10, %p537_p5 }
  0x43   : > { %p540_p2 = pnand %p539_p1, %p533_p0 }
  0x45   : > { %543 = shalt.err (!%p540_p2)
}
  0x46   : > { %439 = dma.hbm_to_vmem [thread:$0]  (!%p747_p11), %s745_s22, 256, %s751_s27, %s147_s4  }
  0x47   : > { %p874_p7 = scmp.ne.s32.totalorder %s865_s20, 0 }
  0x48   : > { %s781_s29 = sand.u32 (!%p874_p7), 1, %s606_s13   ;;  %p875_p3 = scmp.ne.s32.totalorder (!%p874_p7), %s863_s18, 0 }
  0x49   : > { %167 = sbr.rel (%p874_p7) target bundleno = 432 (0x1b0), region = 32  ;;  %s414_s26 = sshll.u32 (!%p874_p7), %s781_s29, 4 }
  0x4a   : > { %s170_s5 = scalar_lea.sflag (!%p874_p7), [#allocation3], %s781_s29  ;;  %s173_s6 = scalar_lea.vmem (!%p874_p7), [#allocation2], %s414_s26 }
  0x50   : > { %589 = dma.done.wait (%p875_p3), %s170_s5, 256  }
  0x51   : > { %591 = vsyncadd (%p875_p3), %s170_s5, 4294967040  ;;  %p876_p11 = scmp.eq.s32.totalorder %s661_s16, 0 }
  0x53   : > { %593 = dma.done.wait (%p876_p11), [#allocation6], 64   ;;  %p877_p4 = pmov %p876_p11 }
  0x54   : > { %vm208_vm0 = vcmask 1043456   ;;  %v200_v0 = vld [vmem:[%s173_s6] sm:$0xff]  ;;  %v201_v1 = vld [vmem:[%s173_s6 + $0x8] sm:$0xff]  ;;  %v618_v11 = vmov 839922192   ;;  %v223_v13 = vlaneseq  ;;  %s423_s22 = sshll.u32 %s661_s16, 8 }
  0x55   : > { %595 = vsyncadd (%p877_p4), [#allocation6], 4294967232  ;;  %v204_v2 = vcombine.high %v200_v0, %v200_v0  ;;  %v205_v3 = vcombine.high %v201_v1, %v201_v1  ;;  %v209_v4 = vsel %vm208_vm0, %v200_v0, 0.0  ;;  %v212_v6 = vsel %vm208_vm0, %v201_v1, 0.0  ;;  %v250_v40 = vld [vmem:[#allocation5] sm:$0xf]  ;;  %s812_s8 = scalar_lea.hbm %s859_s3, %s423_s22 }
  0x56   : > { %v221_v12 = vunpack.c.l.s4 %v618_v11  ;;  %v224_v15 = vshrl.u32 %v223_v13, 7  ;;  %v251_v41 = vld [vmem:[%s858_s2] sm:$0xf]  ;;  %s199_s27 = scalar_lea.vmem [#allocation7], %s414_s26  ;;  %s312_s16 = scalar_lea.sflag [#allocation4], %s781_s29 }
  0x57   : > { %v210_v5 = vsel %vm208_vm0, %v204_v2, 0.0  ;;  %v214_v8 = vsel %vm208_vm0, %v205_v3, 0.0  ;;  %s326_s30 = sshll.u32 %s199_s27, 4  ;;  %s619_s10 = smov [#allocation7]   ;;  %s814_s30 = int_to_ptr.vmem [resolvable:$true] %s326_s30 }
  0x58   : > { %v211_v7 = vadd.f32 %v210_v5, %v209_v4  ;;  %v222_v14 = vunpack.c.0.s8 %v221_v12  ;;  %v266_v36 = vsub.s32 0, %v224_v15  ;;  %v270_v37 = vsub.s32 1, %v224_v15  ;;  %s544_s9 = scalar_lea.vmem %s814_s30, 256  ;;  %s548_s21 = sshll.u32 %s619_s10, 4  ;;  %s549_s21 = int_to_ptr.vmem [resolvable:$false] %s548_s21 }
  0x59   : > { %v274_v38 = vsub.s32 2, %v224_v15  ;;  %v278_v39 = vsub.s32 3, %v224_v15  ;;  %p545_p6 = scmp.ne.s32.totalorder %s814_s30, %s544_s9  ;;  %s550_s24 = scalar_lea.vmem %s549_s21, 512 }
  0x5a   : > { %v213_v9 = vadd.f32 %v212_v6, %v211_v7  ;;  %v225_v16 = vsub.s32 %v222_v14, %v224_v15  ;;  %v267_v42 = vrot.slane %v250_v40, %v266_v36  ;;  %v271_v43 = vrot.slane %v250_v40, %v270_v37  ;;  %p551_p13 = scmp.lt.s32.totalorder %s814_s30, %s549_s21  ;;  %p552_p0 = scmp.lt.s32.totalorder %s550_s24, %s544_s9 }
  0x5b   : > { %v275_v44 = vrot.slane %v250_v40, %v274_v38  ;;  %v279_v45 = vrot.slane %v250_v40, %v278_v39  ;;  %v290_v46 = vrot.slane %v251_v41, %v266_v36  ;;  %v294_v47 = vrot.slane %v251_v41, %v270_v37  ;;  %p546_p9 = pnand %p545_p6, %p732_p8 }
  0x5c   : > { %v215_v10 = vadd.f32 %v214_v8, %v213_v9  ;;  %v298_v48 = vrot.slane %v251_v41, %v274_v38  ;;  %v302_v49 = vrot.slane %v251_v41, %v278_v39  ;;  %v280_v52 = vcombine.low %v267_v42, %v271_v43  ;;  %p553_p5 = por %p552_p0, %p551_p13 }
  0x5d   : > { %v281_v53 = vcombine.low %v275_v44, %v279_v45  ;;  %v303_v56 = vcombine.low %v290_v46, %v294_v47  ;;  %p547_p12 = pneg %p546_p9 }
  0x5e   : > { %216 = vadd.xlane.f32.xlu0 %v215_v10  ;;  %v304_v57 = vcombine.low %v298_v48, %v302_v49 }
  0x5f   : > { %p554_p10 = pnand %p553_p5, %p547_p12 }
  0xeb   : > { %v217_v17 = vpop.xlane.xlu0 %216 }
  0xec   : > { %v218_v18 = vmul.f32 0.001953125, %v217_v17 }
  0xee   : > { %v226_v19 = vrot.slane %v218_v18, %v225_v16 }
  0xf0   : > { %v228_v20 = vsub.f32 %v200_v0, %v226_v19  ;;  %v229_v21 = vsub.f32 %v201_v1, %v226_v19 }
  0xf2   : > { %v230_v22 = vmul.f32 %v228_v20, %v228_v20  ;;  %v231_v23 = vmul.f32 %v229_v21, %v229_v21 }
  0xf4   : > { %v234_v24 = vcombine.high %v230_v22, %v230_v22  ;;  %v235_v25 = vcombine.high %v231_v23, %v231_v23  ;;  %v238_v26 = vsel %vm208_vm0, %v230_v22, 0.0  ;;  %v241_v29 = vsel %vm208_vm0, %v231_v23, 0.0 }
  0xf6   : > { %v239_v27 = vsel %vm208_vm0, %v234_v24, 0.0  ;;  %v243_v31 = vsel %vm208_vm0, %v235_v25, 0.0 }
  0xf7   : > { %v240_v28 = vadd.f32 %v239_v27, %v238_v26 }
  0xf9   : > { %v242_v30 = vadd.f32 %v241_v29, %v240_v28 }
  0xfb   : > { %v244_v32 = vadd.f32 %v243_v31, %v242_v30 }
  0xfd   : > { %245 = vadd.xlane.f32.xlu0 %v244_v32 }
 0x18a   : > { %v246_v33 = vpop.xlane.xlu0 %245 }
 0x18b   : > { %v247_v34 = vmul.f32 0.001953125, %v246_v33 }
 0x18d   : > { %v248_v35 = vadd.f32 1e-07, %v247_v34 }
 0x18f   : > { %484 = vrsqrt.f32 %v248_v35 }
 0x199   : > { %v485_v50 = vpop.eup %484 }
 0x19a   : > { %v259_v51 = vrot.slane %v485_v50, %v225_v16 }
 0x19c   : > { %v261_v54 = vmul.f32 %v259_v51, %v228_v20  ;;  %v262_v55 = vmul.f32 %v259_v51, %v229_v21 }
 0x19e   : > { %v284_v58 = vmul.f32 %v280_v52, %v261_v54  ;;  %v285_v59 = vmul.f32 %v281_v53, %v262_v55 }
 0x1a0   : > { %v307_v60 = vadd.f32 %v303_v56, %v284_v58  ;;  %v308_v61 = vadd.f32 %v304_v57, %v285_v59 }
 0x1a2   : > { %309 = vst [vmem:[%s199_s27] sm:$0xff] %v307_v60  ;;  %310 = vst [vmem:[%s199_s27 + $0x8] sm:$0xff] %v308_v61 }
 0x1a3   : > { %557 = shalt.err (!%p554_p10)
}
 0x1a4   : > { %s558_s25 = scalar_lea.hbm %s812_s8, 256  ;;  %s562_s26 = scalar_lea.hbm %s859_s3, 512 }
 0x1a5   : > { %p559_p1 = scmp.ne.s32.totalorder %s812_s8, %s558_s25  ;;  %p563_p3 = scmp.lt.u32.totalorder %s812_s8, %s859_s3 }
 0x1a6   : > { %p564_p11 = scmp.lt.u32.totalorder %s562_s26, %s558_s25  ;;  %p566_p6 = scmp.lt.u32.totalorder %s558_s25, %s812_s8 }
 0x1a7   : > { %p560_p2 = pnand %p559_p1, %p732_p8 }
 0x1a8   : > { %p565_p4 = por %p564_p11, %p563_p3 }
 0x1a9   : > { %p561_p7 = pneg %p560_p2 }
 0x1aa   : > { %p567_p9 = por %p566_p6, %p565_p4 }
 0x1ac   : > { %p568_p12 = pnand %p567_p9, %p561_p7 }
 0x1ae   : > { %571 = shalt.err (!%p568_p12)
}
 0x1af   : > { %430 = dma.vmem_to_hbm [thread:$0]  (%p732_p8), %s814_s30, 256, %s812_s8, %s312_s16  }
 0x1b0 PF: > { %s338_s18 = sand.u32 1, %s602_s12   ;;  %p878_p13 = scmp.ne.s32.totalorder %s864_s19, 0 }
 0x1b1   : > { %p879_p0 = scmp.ge.s32.totalorder %s614_s15, 2  ;;  %s339_s20 = scalar_lea.sflag [#allocation4], %s338_s18 }
 0x1b3   : > { %p441_p5 = pnand %p879_p0, %p878_p13 }
 0x1b5   : > { %597 = dma.done.wait (!%p441_p5), %s339_s20, 256  }
 0x1b6   : > { %599 = vsyncadd (!%p441_p5), %s339_s20, 4294967040  ;;  %p17_p10 = scmp.ge.s32.totalorder %s688_s23, 4   ;;  %s880_s12 = smov %s606_s13 }
 0x1b7   : > { %s881_s13 = smov %s610_s14  ;;  %s882_s14 = smov %s724_s11 }
 0x1b8   : > { %s883_s15 = smov %s688_s23  ;;  %19 = sbr.rel (!%p17_p10) target bundleno = 6 (0x6), region = 81 }
 0x1bf   :  { %344 = vsyncpa [#allocation3], 1 }
 0x1c0   :  { %346 = vsyncpa [#allocation3 + $0x1], 1 }
 0x1c1   :  { %347 = vsyncpa [#allocation6], 1 }
 0x1c2   :  { %348 = vsyncpa [#allocation4], 1 }
 0x1c3   :  { %350 = vsyncpa [#allocation4 + $0x1], 1 }

</bundles_post_ra>
